<compile_context>
chip_gen: v7x
topology: tpu7x:2x2x1
jax: 0.10.0
libtpu: 0.0.40
codegen_flags: <defaults>
</compile_context>

<pallas_src>
import functools

import jax
import jax.numpy as jnp
from jax.experimental import pallas as pl
from jax.experimental.pallas import tpu as pltpu


# ---------------------------------------------------------------------------
# Main path: fused single pass.  One grid step = NB whole batch elements.
def _se_fused_kernel(x_ref, wd_ref, bd_ref, wu_ref, bu_ref, o_ref, *, inv_hw):
    # x_ref:  (NB, C, HW)  spatial flattened onto lanes
    # wd_ref: (C, R)  bd_ref: (1, R)  wu_ref: (R, C)  bu_ref: (1, C)

    # squeeze: global average pool = sum * (1/HW).  The read streams straight
    # into the f32 reduction -- no full-tile f32 copy is materialized.
    pooled = jnp.sum(x_ref[...].astype(jnp.float32), axis=-1) * inv_hw      # (NB, C)

    # excitation: 1x1 conv (== dense) -> relu -> 1x1 conv -> sigmoid, f32 on
    # the tiny (NB, C)/(NB, R) tiles only.
    h = jnp.dot(pooled, wd_ref[...].astype(jnp.float32),
                preferred_element_type=jnp.float32) + bd_ref[...].astype(jnp.float32)
    h = jnp.maximum(h, 0.0)
    s = jnp.dot(h, wu_ref[...].astype(jnp.float32),
                preferred_element_type=jnp.float32) + bu_ref[...].astype(jnp.float32)
    s = jax.nn.sigmoid(s)                                                   # (NB, C)

    # scale: second direct read of x; multiply in the native dtype (bf16 stays
    # bf16 on the VPU on v6e/v7x) and store.
    gate = s.astype(o_ref.dtype)
    o_ref[...] = x_ref[...] * gate[:, :, None]


# ---------------------------------------------------------------------------
# Fallback path, pass 1: grid (N, HW-chunks).  Accumulate per-channel sums in
# the resident (1, 1, C) f32 output across the "arbitrary" chunk axis; at the
# last chunk convert the sums into the sigmoid gate in place.
def _se_gate_kernel(x_ref, wd_ref, bd_ref, wu_ref, bu_ref, g_ref, *,
                    inv_hw, hw, hwc, need_mask):
    k = pl.program_id(1)

    @pl.when(k == 0)
    def _():
        g_ref[...] = jnp.zeros_like(g_ref)

    x = x_ref[...].astype(jnp.float32)                         # (1, C, HWc)
    if need_mask:  # last chunk may be partial: zero the out-of-range lanes
        lane = jax.lax.broadcasted_iota(jnp.int32, x.shape, 2)
        x = jnp.where(k * hwc + lane < hw, x, 0.0)
    g_ref[...] += jnp.sum(x, axis=-1)[:, None, :]

    @pl.when(k == pl.num_programs(1) - 1)
    def _():
        pooled = g_ref[...][:, 0, :] * inv_hw                   # (1, C)
        h = jnp.dot(pooled, wd_ref[...].astype(jnp.float32),
                    preferred_element_type=jnp.float32) + bd_ref[...].astype(jnp.float32)
        h = jnp.maximum(h, 0.0)
        s = jnp.dot(h, wu_ref[...].astype(jnp.float32),
                    preferred_element_type=jnp.float32) + bu_ref[...].astype(jnp.float32)
        g_ref[...] = jax.nn.sigmoid(s)[:, None, :]


# Fallback path, pass 2: grid (N, HW-chunks).  Apply the precomputed gate.
def _se_scale_kernel(x_ref, g_ref, o_ref):
    gate = g_ref[...][:, 0, :].astype(o_ref.dtype)             # (1, C)
    o_ref[...] = x_ref[...] * gate[:, :, None]


def _largest_divisor_leq(n, cap):
    return max(d for d in range(1, n + 1) if n % d == 0 and d <= cap)


def se_block(x_nchw, w_down, b_down, w_up, b_up):
    """SEBlock forward.  x_nchw (N,C,H,W); w_down (R,C); b_down (R,);
    w_up (C,R); b_up (C,).  Returns (N,C,H,W) in x_nchw.dtype."""
    # TODO(synk): F.avg_pool2d(kernel_size=W) with H != W pools WxW windows;
    # this kernel implements the global pool (H == W), the intended SEBlock use.
    N, C, H, W = x_nchw.shape
    R = w_down.shape[0]
    HW = H * W

    # Layout: flatten spatial onto lanes.  No HBM pad / post-call slice.
    x = x_nchw.reshape(N, C, HW)
    wd_t = w_down.T                      # (C, R)  down 1x1-conv as dense
    wu_t = w_up.T                        # (R, C)  up   1x1-conv as dense
    bd = b_down.reshape(1, R)
    bu = b_up.reshape(1, C)

    # Generation-aware VMEM budget (~32 MiB scoped on v7x's 64 MiB/TC,
    # 48 MiB on v5e/v6e's 128 MiB).
    try:
        vmem_cap = int(pltpu.get_tpu_info().vmem_capacity_bytes)
    except Exception:                    # conservative default if query fails
        vmem_cap = 64 * 1024 * 1024
    vmem_limit = min(vmem_cap // 2, 48 * 1024 * 1024)
    # Per-step x tile cap (~4-6 MiB, the HBM-BW plateau).  2x in + 2x out
    # double-buffered tiles stay <= vmem_limit/2; the remaining headroom
    # covers the weights and the tiny (NB, C) f32 intermediates.
    tile_cap = max(512 * 1024, vmem_limit // 8)

    itemsize = jnp.dtype(x.dtype).itemsize
    bytes_per_n = C * HW * itemsize
    inv_hw = 1.0 / float(HW)

    use_split = (HW >= 256) and (
        bytes_per_n > tile_cap or (N == 1 and bytes_per_n > (1 << 20)))

    if not use_split:
        # ---- fused single pass, grid over batch ----------------------------
        nb_cap = max(1, tile_cap // max(1, bytes_per_n))
        desired_steps = 8                # keep both v7x cores fed + pipelined
        nb_cap = min(nb_cap, N // desired_steps) if N >= desired_steps else 1
        nb_cap = max(1, nb_cap)
        NB = _largest_divisor_leq(N, nb_cap)
        grid = (N // NB,)

        kernel = functools.partial(_se_fused_kernel, inv_hw=inv_hw)
        out = pl.pallas_call(
            kernel,
            out_shape=jax.ShapeDtypeStruct((N, C, HW), x.dtype),
            grid_spec=pltpu.PrefetchScalarGridSpec(
                num_scalar_prefetch=0,
                grid=grid,
                in_specs=[
                    pl.BlockSpec((NB, C, HW), lambda n: (n, 0, 0)),
                    pl.BlockSpec((C, R), lambda n: (0, 0)),
                    pl.BlockSpec((1, R), lambda n: (0, 0)),
                    pl.BlockSpec((R, C), lambda n: (0, 0)),
                    pl.BlockSpec((1, C), lambda n: (0, 0)),
                ],
                out_specs=pl.BlockSpec((NB, C, HW), lambda n: (n, 0, 0)),
            ),
            compiler_params=pltpu.CompilerParams(
                dimension_semantics=("parallel",),
                vmem_limit_bytes=vmem_limit,
            ),
        )(x, wd_t, bd, wu_t, bu)
        return out.reshape(N, C, H, W)

    # ---- two-pass spatially-split path (oversized per-batch tile or N==1) --
    max_hwc = max(128, (tile_cap // max(1, C * itemsize)) // 128 * 128)
    target_hwc = max(128, ((-(-HW // 8)) + 127) // 128 * 128)   # ~8 chunks
    HWc = min(max_hwc, target_hwc)
    KC = (HW + HWc - 1) // HWc
    need_mask = (HW % HWc) != 0

    gate_kernel = functools.partial(
        _se_gate_kernel, inv_hw=inv_hw, hw=HW, hwc=HWc, need_mask=need_mask)
    gate = pl.pallas_call(
        gate_kernel,
        out_shape=jax.ShapeDtypeStruct((N, 1, C), jnp.float32),
        grid_spec=pltpu.PrefetchScalarGridSpec(
            num_scalar_prefetch=0,
            grid=(N, KC),
            in_specs=[
                pl.BlockSpec((1, C, HWc), lambda n, k: (n, 0, k)),
                pl.BlockSpec((C, R), lambda n, k: (0, 0)),
                pl.BlockSpec((1, R), lambda n, k: (0, 0)),
                pl.BlockSpec((R, C), lambda n, k: (0, 0)),
                pl.BlockSpec((1, C), lambda n, k: (0, 0)),
            ],
            out_specs=pl.BlockSpec((1, 1, C), lambda n, k: (n, 0, 0)),
        ),
        compiler_params=pltpu.CompilerParams(
            dimension_semantics=("parallel", "arbitrary"),
            vmem_limit_bytes=vmem_limit,
        ),
    )(x, wd_t, bd, wu_t, bu)

    out = pl.pallas_call(
        _se_scale_kernel,
        out_shape=jax.ShapeDtypeStruct((N, C, HW), x.dtype),
        grid_spec=pltpu.PrefetchScalarGridSpec(
            num_scalar_prefetch=0,
            grid=(N, KC),
            in_specs=[
                pl.BlockSpec((1, C, HWc), lambda n, k: (n, 0, k)),
                pl.BlockSpec((1, 1, C), lambda n, k: (n, 0, 0)),
            ],
            out_specs=pl.BlockSpec((1, C, HWc), lambda n, k: (n, 0, k)),
        ),
        compiler_params=pltpu.CompilerParams(
            dimension_semantics=("parallel", "parallel"),
            vmem_limit_bytes=vmem_limit,
        ),
    )(x, gate)
    return out.reshape(N, C, H, W)


def _reference(x, w_down, b_down, w_up, b_up):
    pooled = jnp.mean(x, axis=(2, 3))                              # (N, C)
    h = jax.nn.relu(pooled @ w_down.T + b_down)                    # (N, R)
    s = jax.nn.sigmoid(h @ w_up.T + b_up)                          # (N, C)
    return x * s[:, :, None, None]


if __name__ == "__main__":
    N, C, R, H, W = 2, 4, 2, 16, 16   # input_channels=4, internal_neurons=2
    key = jax.random.PRNGKey(0)
    kx, k1, k2, k3, k4 = jax.random.split(key, 5)
    x = jax.random.normal(kx, (N, C, H, W), dtype=jnp.float32)
    w_down = jax.random.normal(k1, (R, C), dtype=jnp.float32) * 0.1
    b_down = jax.random.normal(k2, (R,), dtype=jnp.float32) * 0.1
    w_up = jax.random.normal(k3, (C, R), dtype=jnp.float32) * 0.1
    b_up = jax.random.normal(k4, (C,), dtype=jnp.float32) * 0.1

    out = se_block(x, w_down, b_down, w_up, b_up)
    out = jax.block_until_ready(out)

    ref = _reference(x, w_down, b_down, w_up, b_up)
    assert jnp.allclose(out, ref, atol=1e-5, rtol=1e-5), "mismatch vs reference"
    print("KERNEL_OK")
</pallas_src>

<mosaic_0001>
module attributes {stable_mosaic.version = 11 : i64} {
  func.func @_se_fused_kernel(%arg0: i32, %arg1: memref<1x4x256xf32, #tpu.memory_space<vmem>>, %arg2: memref<4x2xf32, #tpu.memory_space<vmem>>, %arg3: memref<1x2xf32, #tpu.memory_space<vmem>>, %arg4: memref<2x4xf32, #tpu.memory_space<vmem>>, %arg5: memref<1x4xf32, #tpu.memory_space<vmem>>, %arg6: memref<1x4x256xf32, #tpu.memory_space<vmem>>) attributes {dimension_semantics = [#tpu.dimension_semantics<parallel>], iteration_bounds = array<i64: 2>, scalar_prefetch = 0 : i64, scratch_operands = 0 : i64, tpu.core_type = #tpu.core_type<tc>, window_params = [{transform_indices = @transform_0, window_bounds = array<i64: 1, 4, 256>}, {pipeline_mode = #tpu.pipeline_mode<synchronous>, transform_indices = @transform_1, window_bounds = array<i64: 4, 2>}, {pipeline_mode = #tpu.pipeline_mode<synchronous>, transform_indices = @transform_2, window_bounds = array<i64: 1, 2>}, {pipeline_mode = #tpu.pipeline_mode<synchronous>, transform_indices = @transform_3, window_bounds = array<i64: 2, 4>}, {pipeline_mode = #tpu.pipeline_mode<synchronous>, transform_indices = @transform_4, window_bounds = array<i64: 1, 4>}, {transform_indices = @transform_5, window_bounds = array<i64: 1, 4, 256>}]} {
    %c0 = arith.constant 0 : index
    %c0_0 = arith.constant 0 : index
    %c0_1 = arith.constant 0 : index
    %0 = vector.load %arg1[%c0, %c0_0, %c0_1] : memref<1x4x256xf32, #tpu.memory_space<vmem>>, vector<1x4x256xf32>
    %cst = arith.constant dense<0.000000e+00> : vector<1x4xf32>
    %1 = vector.multi_reduction <add>, %0, %cst [2] : vector<1x4x256xf32> to vector<1x4xf32>
    %cst_2 = arith.constant 3.906250e-03 : f32
    %2 = vector.broadcast %cst_2 : f32 to vector<1x4xf32>
    %3 = arith.mulf %1, %2 : vector<1x4xf32>
    %c0_3 = arith.constant 0 : index
    %c0_4 = arith.constant 0 : index
    %4 = vector.load %arg2[%c0_3, %c0_4] : memref<4x2xf32, #tpu.memory_space<vmem>>, vector<4x2xf32>
    %cst_5 = arith.constant dense<0.000000e+00> : vector<1x2xf32>
    %5 = tpu.matmul %3, %4, %cst_5 {dimension_numbers = #tpu.dot_dimension_numbers<[1], [0], [0], [1], [0, 0, 1, 1], [], []>} : vector<1x4xf32>, vector<4x2xf32>, vector<1x2xf32> -> vector<1x2xf32>
    %c0_6 = arith.constant 0 : index
    %c0_7 = arith.constant 0 : index
    %6 = vector.load %arg3[%c0_6, %c0_7] : memref<1x2xf32, #tpu.memory_space<vmem>>, vector<1x2xf32>
    %7 = arith.addf %5, %6 : vector<1x2xf32>
    %cst_8 = arith.constant 0.000000e+00 : f32
    %8 = vector.broadcast %cst_8 : f32 to vector<1x2xf32>
    %9 = arith.maximumf %7, %8 : vector<1x2xf32>
    %c0_9 = arith.constant 0 : index
    %c0_10 = arith.constant 0 : index
    %10 = vector.load %arg4[%c0_9, %c0_10] : memref<2x4xf32, #tpu.memory_space<vmem>>, vector<2x4xf32>
    %cst_11 = arith.constant dense<0.000000e+00> : vector<1x4xf32>
    %11 = tpu.matmul %9, %10, %cst_11 {dimension_numbers = #tpu.dot_dimension_numbers<[1], [0], [0], [1], [0, 0, 1, 1], [], []>} : vector<1x2xf32>, vector<2x4xf32>, vector<1x4xf32> -> vector<1x4xf32>
    %c0_12 = arith.constant 0 : index
    %c0_13 = arith.constant 0 : index
    %12 = vector.load %arg5[%c0_12, %c0_13] : memref<1x4xf32, #tpu.memory_space<vmem>>, vector<1x4xf32>
    %13 = arith.addf %11, %12 : vector<1x4xf32>
    %14 = arith.negf %13 : vector<1x4xf32>
    %15 = math.exp %14 : vector<1x4xf32>
    %cst_14 = arith.constant 1.000000e+00 : f32
    %16 = vector.broadcast %cst_14 : f32 to vector<1x4xf32>
    %17 = arith.addf %16, %15 : vector<1x4xf32>
    %18 = arith.divf %16, %17 : vector<1x4xf32>
    %c0_15 = arith.constant 0 : index
    %c0_16 = arith.constant 0 : index
    %c0_17 = arith.constant 0 : index
    %19 = vector.load %arg1[%c0_15, %c0_16, %c0_17] : memref<1x4x256xf32, #tpu.memory_space<vmem>>, vector<1x4x256xf32>
    %20 = vector.shape_cast %18 : vector<1x4xf32> to vector<1x4x1xf32>
    %21 = vector.broadcast %20 : vector<1x4x1xf32> to vector<1x4x256xf32>
    %22 = arith.mulf %19, %21 : vector<1x4x256xf32>
    %c0_18 = arith.constant 0 : index
    %c0_19 = arith.constant 0 : index
    %c0_20 = arith.constant 0 : index
    %23 = vector.load %arg6[%c0_18, %c0_19, %c0_20] : memref<1x4x256xf32, #tpu.memory_space<vmem>>, vector<1x4x256xf32>
    tpu.vector_store %arg6[%c0_18, %c0_19, %c0_20], %22 {strides = array<i32>} : memref<1x4x256xf32, #tpu.memory_space<vmem>>, vector<1x4x256xf32>,
    return
  }
  func.func @transform_0(%arg0: i32) -> (i32, i32, i32) {
    %c0_i32 = arith.constant 0 : i32
    %c0_i32_0 = arith.constant 0 : i32
    %c0_i32_1 = arith.constant 0 : i32
    return %arg0, %c0_i32, %c0_i32_0 : i32, i32, i32
  }
  func.func @transform_1(%arg0: i32) -> (i32, i32) {
    %c0_i32 = arith.constant 0 : i32
    %c0_i32_0 = arith.constant 0 : i32
    %c0_i32_1 = arith.constant 0 : i32
    return %c0_i32, %c0_i32_0 : i32, i32
  }
  func.func @transform_2(%arg0: i32) -> (i32, i32) {
    %c0_i32 = arith.constant 0 : i32
    %c0_i32_0 = arith.constant 0 : i32
    %c0_i32_1 = arith.constant 0 : i32
    return %c0_i32, %c0_i32_0 : i32, i32
  }
  func.func @transform_3(%arg0: i32) -> (i32, i32) {
    %c0_i32 = arith.constant 0 : i32
    %c0_i32_0 = arith.constant 0 : i32
    %c0_i32_1 = arith.constant 0 : i32
    return %c0_i32, %c0_i32_0 : i32, i32
  }
  func.func @transform_4(%arg0: i32) -> (i32, i32) {
    %c0_i32 = arith.constant 0 : i32
    %c0_i32_0 = arith.constant 0 : i32
    %c0_i32_1 = arith.constant 0 : i32
    return %c0_i32, %c0_i32_0 : i32, i32
  }
  func.func @transform_5(%arg0: i32) -> (i32, i32, i32) {
    %c0_i32 = arith.constant 0 : i32
    %c0_i32_0 = arith.constant 0 : i32
    %c0_i32_1 = arith.constant 0 : i32
    return %arg0, %c0_i32, %c0_i32_0 : i32, i32, i32
  }
}

</mosaic_0001>

<bundles_post_ra>
// kernel: tpu_custom_call.1
= control target key start
LH: loop header
LB: loop body
LE: loop exit
PB: predicated region body
PF: predicated region fallthrough
CT: control target
= control target key end

     0   :  { %10 = vsyncpa [#allocation3], 0  ;;  %s926_s0 = inlined_call_operand.hbm [shape: f32[2,4,256], index: 0, kind: input, shape index: {}]   ;;  %s927_s1 = inlined_call_operand.vmem [shape: f32[4,2], index: 1, kind: input, shape index: {}]   ;;  %s928_s2 = inlined_call_operand.vmem [shape: f32[1,2], index: 2, kind: input, shape index: {}]   ;;  %s929_s3 = inlined_call_operand.vmem [shape: f32[2,4], index: 3, kind: input, shape index: {}]   ;;  %s930_s4 = inlined_call_operand.vmem [shape: f32[1,4], index: 4, kind: input, shape index: {}]   ;;  %s931_s5 = inlined_call_operand.hbm [shape: f32[2,4,256], index: 5, kind: output, shape index: {}]  }
   0x1   :  { %12 = vsyncpa [#allocation3 + $0x1], 0 }
   0x2   :  { %13 = vsyncpa [#allocation4], 0 }
   0x3   :  { %15 = vsyncpa [#allocation4 + $0x1], 0  ;;  %s749_s18 = smov 0   ;;  %s751_s19 = smov 0  }
   0x4   :  { %s753_s20 = smov 0   ;;  %s755_s21 = smov 0  }
   0x5 LB: > { %s770_s22 = sadd.s32 4294967295, %s712_s21   ;;  %s527_s23 = sadd.s32 4294967294, %s712_s21   ;;  %s712_s21 = sphi %s755_s21, %s946_s21   ;;  %s708_s20 = sphi %s753_s20, %s945_s20   ;;  %s704_s19 = sphi %s751_s19, %s944_s19   ;;  %s700_s18 = sphi %s749_s18, %s943_s18  }
   0x6   : > { %s774_s24 = sadd.s32 1, %s712_s21   ;;  %s28_s25 = sadd.s32 1, %s708_s20 }
   0x7   : > { %s25_s26 = ssub.s32 %s712_s21, %s774_s24  ;;  %p35_p0 = scmp.ne.s32.totalorder %s708_s20, %s704_s19 }
   0x8   : > { %p26_p1 = scmp.eq.s32.totalorder %s25_s26, 0  ;;  %p36_p2 = scmp.eq.s32.totalorder %s712_s21, 0 }
   0x9   : > { %p41_p3 = scmp.ne.s32.totalorder %s704_s19, %s700_s18  ;;  %p42_p4 = scmp.eq.s32.totalorder %s770_s22, 0 }
   0xa   : > { %s786_s27 = scalar_select %p26_p1, %s708_s20, %s28_s25  }
   0xb   : > { %p788_p5 = por %p36_p2, %p35_p0  ;;  %p792_p6 = por %p42_p4, %p41_p3 }
   0xc   : > { %p149_p7 = scmp.eq.s32.totalorder %s770_s22, 1  ;;  %p155_p8 = scmp.eq.s32.totalorder %s527_s23, 1 }
   0xd   : > { %p574_p10 = scmp.lt.s32.totalorder %s712_s21, 2  ;;  %s187_s7 = sand.u32 1, %s708_s20  }
   0xe   : > { %p799_p11 = por %p149_p7, %p35_p0  ;;  %p803_p12 = por %p155_p8, %p41_p3 }
   0xf   : > { %s546_s8 = sshll.u32 %s712_s21, 7  ;;  %s530_s9 = sshll.u32 %s187_s7, 3 }
  0x10   : > { %s935_s30 = scalar_select %p799_p11, 1, 0 }
  0x11   : > { %s936_s6 = scalar_select %p803_p12, 1, 0 }
  0x12   : > { %s812_s12 = scalar_lea.hbm %s926_s0, %s546_s8  ;;  %s191_s13 = scalar_lea.vmem [#allocation2], %s530_s9 }
  0x13   : > { %s199_s14 = sshll.u32 %s191_s13, 4  ;;  %p816_p13 = pnand %p574_p10, %p788_p5  ;;  %s820_s14 = int_to_ptr.vmem [resolvable:$true] %s199_s14 }
  0x14   : > { %s188_s16 = scalar_lea.sflag [#allocation3], %s187_s7  ;;  %s616_s17 = scalar_lea.hbm %s812_s12, 128 }
  0x15   : > { %p617_p2 = scmp.ne.s32.totalorder %s812_s12, %s616_s17  ;;  %p618_p3 = pneg %p816_p13 }
  0x16   : > { %s621_s26 = scalar_lea.hbm %s926_s0, 256  ;;  %p622_p5 = scmp.lt.u32.totalorder %s812_s12, %s926_s0 }
  0x17   : > { %p619_p4 = pnand %p618_p3, %p617_p2  ;;  %p623_p8 = scmp.lt.u32.totalorder %s621_s26, %s616_s17 }
  0x18   : > { %p625_p9 = scmp.lt.u32.totalorder %s616_s17, %s812_s12 }
  0x19   : > { %p620_p7 = pneg %p619_p4  ;;  %p624_p10 = por %p623_p8, %p622_p5 }
  0x1b   : > { %p626_p0 = por %p625_p9, %p624_p10 }
  0x1d   : > { %p627_p1 = pnand %p626_p0, %p620_p7 }
  0x1f   : > { %630 = shalt.err (!%p627_p1)
}
  0x20   : > { %s631_s7 = scalar_lea.vmem %s820_s14, 128  ;;  %s714_s9 = smov [#allocation2]  }
  0x21   : > { %p632_p2 = scmp.ne.s32.totalorder %s820_s14, %s631_s7  ;;  %s636_s10 = sshll.u32 %s714_s9, 4  ;;  %s637_s10 = int_to_ptr.vmem [resolvable:$false] %s636_s10 }
  0x22   : > { %s638_s11 = scalar_lea.vmem %s637_s10, 256  ;;  %p639_p11 = scmp.lt.s32.totalorder %s820_s14, %s637_s10 }
  0x23   : > { %p634_p4 = pnand %p632_p2, %p618_p3  ;;  %p640_p5 = scmp.lt.s32.totalorder %s638_s11, %s631_s7 }
  0x25   : > { %p635_p12 = pneg %p634_p4  ;;  %p641_p8 = por %p640_p5, %p639_p11 }
  0x27   : > { %p642_p9 = pnand %p641_p8, %p635_p12 }
  0x29   : > { %645 = shalt.err (!%p642_p9)
}
  0x2a   : > { %569 = dma.hbm_to_vmem [thread:$0]  (!%p816_p13), %s812_s12, 128, %s820_s14, %s188_s16  }
  0x2b   : > { %p938_p0 = scmp.lt.s32.totalorder %s712_s21, 3  ;;  %p939_p1 = scmp.ge.s32.totalorder %s712_s21, 1 }
  0x2d   : > { %p205_p3 = pnand %p939_p1, %p938_p0 }
  0x2e   : > { %s854_s13 = sand.u32 (!%p205_p3), 1, %s704_s19  }
  0x2f   : > { %208 = sbr.rel (%p205_p3) target bundleno = 798 (0x31e), region = 40  ;;  %s534_s17 = sshll.u32 (!%p205_p3), %s854_s13, 3 }
  0x30   : > { %s211_s23 = scalar_lea.sflag (!%p205_p3), [#allocation3], %s854_s13  ;;  %s214_s15 = scalar_lea.vmem (!%p205_p3), [#allocation2], %s534_s17 }
  0x36   : > { %691 = dma.done.wait (%p792_p6), %s211_s23, 128  }
  0x37   : > { %693 = vsyncadd (%p792_p6), %s211_s23, 4294967168  ;;  %vm245_vm0 = vcmask 1043456   ;;  %v241_v0 = vld [vmem:[%s214_s15] sm:$0xff]  ;;  %v715_v5 = vmov 0.0   ;;  %vm716_vm1 = vmmov 0   ;;  %v255_v7 = vlaneseq  ;;  %s547_s7 = sshll.u32 %s770_s22, 7 }
  0x38   : > { %v243_v1 = vcombine.high %v241_v0, %v241_v0  ;;  %v246_v2 = vsel %vm245_vm0, %v241_v0, 0.0  ;;  %552 = vmatprep.subr.mxu0 %v715_v5  ;;  %v252_v6 = vld [vmem:[%s927_s1] sm:$0xf]  ;;  %557 = vmatprep.subr.mxu1 %v715_v5  ;;  %vm261_vm2 = vcmask 31744   ;;  %vm344_vm3 = vcmask 1041408   ;;  %s240_s9 = scalar_lea.vmem [#allocation5], %s534_s17  ;;  %s882_s15 = scalar_lea.hbm %s931_s5, %s547_s7 }
  0x39   : > { %553 = vmatpush3.msk.msra.mxu0 %vm245_vm0, %v252_v6  ;;  %554 = vmatprep.mubr.msk.f32.mxu0 %vm716_vm1, %v715_v5  ;;  %v256_v8 = vand.u32 127, %v255_v7  ;;  %v258_v9 = vshrl.u32 %v255_v7, 7  ;;  %v338_v14 = vld [vmem:[%s929_s3] sm:$0x3]  ;;  %vm340_vm4 = vcmask 15360   ;;  %s457_s10 = sshll.u32 %s240_s9, 4  ;;  %s884_s10 = int_to_ptr.vmem [resolvable:$true] %s457_s10 }
  0x3a   : > { %v247_v3 = vsel %vm245_vm0, %v243_v1, 0.0  ;;  %559 = vmatprep.mubr.msk.f32.mxu1 %vm716_vm1, %v715_v5  ;;  %558 = vmatpush3.msk.msra.mxu1 %vm344_vm3, %v338_v14  ;;  %v253_v15 = vld [vmem:[%s928_s2] sm:$0x1]  ;;  %v717_v30 = vmov 839922192   ;;  %s443_s12 = scalar_lea.sflag [#allocation4], %s854_s13 }
  0x3b   : > { %v248_v4 = vadd.f32 %v247_v3, %v246_v2  ;;  %v259_v10 = vsub.s32 %v256_v8, %v258_v9  ;;  %v339_v20 = vld [vmem:[%s930_s4] sm:$0x1]  ;;  %v426_v27 = vsub.s32 0, %v258_v9  ;;  %v433_v31 = vunpack.c.l.s4 %v717_v30  ;;  %s646_s14 = scalar_lea.vmem %s884_s10, 128  ;;  %p940_p11 = scmp.ne.s32.totalorder %s935_s30, 0 }
  0x3c   : > { %p647_p6 = scmp.ne.s32.totalorder %s884_s10, %s646_s14  ;;  %s718_s22 = smov [#allocation5]  }
  0x3d   : > { %249 = vadd.xlane.f32.xlu0 %v248_v4  ;;  %v434_v32 = vunpack.c.0.s8 %v433_v31  ;;  %s650_s17 = sshll.u32 %s718_s22, 4  ;;  %s651_s17 = int_to_ptr.vmem [resolvable:$false] %s650_s17 }
  0x3e   : > { %p648_p12 = pnand %p647_p6, %p940_p11  ;;  %s652_s29 = scalar_lea.vmem %s651_s17, 256 }
  0x3f   : > { %v437_v33 = vsub.s32 %v434_v32, %v258_v9  ;;  %p653_p7 = scmp.lt.s32.totalorder %s884_s10, %s651_s17  ;;  %p654_p10 = scmp.lt.s32.totalorder %s652_s29, %s646_s14 }
  0x40   : > { %p649_p13 = pneg %p648_p12 }
  0x41   : > { %p655_p2 = por %p654_p10, %p653_p7 }
  0x43   : > { %p656_p4 = pnand %p655_p2, %p649_p13 }
  0xca   : > { %v250_v11 = vpop.xlane.xlu0 %249 }
  0xcb   : > { %v251_v12 = vmul.f32 0.00390625, %v250_v11 }
  0xcd   : > { %v260_v13 = vrot.slane %v251_v12, %v259_v10 }
  0xcf   : > { %555 = vmatmul.mubr.msk.f32.vlgmr.msra.gmra.mrb[0].mxu0 %vm261_vm2, %v260_v13 }
 0x1a2   : > { %v333_v16 = vpop.f32.mrb[0].mxu0 }
 0x1a3   : > { %v334_v17 = vadd.f32 %v333_v16, %v253_v15  ;;  %v556_v18 = vpop.f32.mrb[1].mxu0 }
 0x1a5   : > { %v337_v19 = vmax.f32 %v334_v17, 0.0 }
 0x1a7   : > { %560 = vmatmul.mubr.msk.f32.vlgmr.msra.gmra.mrb[0].mxu1 %vm340_vm4, %v337_v19 }
 0x27a   : > { %v414_v21 = vpop.f32.mrb[0].mxu1 }
 0x27b   : > { %v415_v22 = vadd.f32 %v414_v21, %v339_v20  ;;  %v561_v23 = vpop.f32.mrb[1].mxu1 }
 0x27d   : > { %v540_v24 = vmul.f32 -1.442695, %v415_v22 }
 0x27f   : > { %612 = vpow2.f32 %v540_v24 }
 0x289   : > { %v613_v25 = vpop.eup %612 }
 0x28a   : > { %v421_v26 = vadd.f32 1.0, %v613_v25 }
 0x28c   : > { %614 = vrcp.f32 %v421_v26 }
 0x296   : > { %v615_v28 = vpop.eup %614 }
 0x297   : > { %v427_v29 = vrot.slane %v615_v28, %v426_v27 }
 0x299   : > { %429 = vbcast.lane.b32.xlu0 %v427_v29, 256 }
 0x30b   : > { %v430_v34 = vpop.permute.xlu0 %429 }
 0x30c   : > { %v438_v35 = vrot.slane %v430_v34, %v437_v33 }
 0x30e   : > { %v440_v36 = vmul.f32 %v438_v35, %v241_v0 }
 0x310   : > { %441 = vst [vmem:[%s240_s9] sm:$0xff] %v440_v36 }
 0x311   : > { %659 = shalt.err (!%p656_p4)
}
 0x312   : > { %s660_s13 = scalar_lea.hbm %s882_s15, 128  ;;  %s664_s26 = scalar_lea.hbm %s931_s5, 256 }
 0x313   : > { %p661_p5 = scmp.ne.s32.totalorder %s882_s15, %s660_s13  ;;  %p665_p0 = scmp.lt.u32.totalorder %s882_s15, %s931_s5 }
 0x314   : > { %p666_p1 = scmp.lt.u32.totalorder %s664_s26, %s660_s13  ;;  %p668_p6 = scmp.lt.u32.totalorder %s660_s13, %s882_s15 }
 0x315   : > { %p662_p8 = pnand %p661_p5, %p940_p11 }
 0x316   : > { %p667_p3 = por %p666_p1, %p665_p0 }
 0x317   : > { %p663_p9 = pneg %p662_p8 }
 0x318   : > { %p669_p12 = por %p668_p6, %p667_p3 }
 0x31a   : > { %p670_p13 = pnand %p669_p12, %p663_p9 }
 0x31c   : > { %673 = shalt.err (!%p670_p13)
}
 0x31d   : > { %564 = dma.vmem_to_hbm [thread:$0]  (%p940_p11), %s884_s10, 128, %s882_s15, %s443_s12  }
 0x31e PF: > { %s469_s7 = sand.u32 1, %s700_s18   ;;  %p941_p7 = scmp.ne.s32.totalorder %s936_s6, 0 }
 0x31f   : > { %p942_p10 = scmp.ge.s32.totalorder %s712_s21, 2  ;;  %s470_s9 = scalar_lea.sflag [#allocation4], %s469_s7 }
 0x321   : > { %p571_p2 = pnand %p942_p10, %p941_p7 }
 0x323   : > { %695 = dma.done.wait (!%p571_p2), %s470_s9, 128  }
 0x324   : > { %697 = vsyncadd (!%p571_p2), %s470_s9, 4294967168  ;;  %p18_p4 = scmp.ge.s32.totalorder %s774_s24, 4   ;;  %s943_s18 = smov %s704_s19 }
 0x325   : > { %s944_s19 = smov %s708_s20  ;;  %s945_s20 = smov %s786_s27 }
 0x326   : > { %s946_s21 = smov %s774_s24  ;;  %20 = sbr.rel (!%p18_p4) target bundleno = 5 (0x5), region = 85 }
 0x32d   :  { %475 = vsyncpa [#allocation3], 1 }
 0x32e   :  { %477 = vsyncpa [#allocation3 + $0x1], 1 }
 0x32f   :  { %478 = vsyncpa [#allocation4], 1 }
 0x330   :  { %480 = vsyncpa [#allocation4 + $0x1], 1 }

</bundles_post_ra>
